<compile_context>
chip_gen: v7x
topology: tpu7x:2x2x1
jax: 0.10.0
libtpu: 0.0.40
codegen_flags: <defaults>
</compile_context>

<pallas_src>
import functools

import jax
import jax.numpy as jnp
from jax import lax
from jax.experimental import pallas as pl
from jax.experimental.pallas import tpu as pltpu


# ---------------------------------------------------------------------------
# Fused kernel: per (batch, q-tile, head) grid step
#   q = x_qtile @ Wq_h ; k,v = x_full @ Wk_h, Wv_h      (per-head contiguous weights)
#   s = q @ k^T (dot_general, no transpose), tile-local causal mask, softmax
#   acc += (softmax(s) @ v) @ W_fc^T[h]                 (fc_out fused as the reduction)
#   last head: o = acc + bias
# ---------------------------------------------------------------------------
def _mha_fc_kernel(xq_ref, xkv_ref, wqkv_ref, wfc_ref, bfc_ref, o_ref, acc_ref,
                   *, embed_size, tq, compute_dtype):
    E = embed_size
    cd = compute_dtype
    h = pl.program_id(2)

    @pl.when(h == 0)
    def _init():
        acc_ref[...] = jnp.zeros_like(acc_ref)

    xq = xq_ref[...].astype(cd)          # (TQ, E)   query rows for this tile
    xkv = xkv_ref[...].astype(cd)        # (T,  E)   full sequence for K/V
    w = wqkv_ref[...].astype(cd)         # (E, 3E)   this head's [Wq^T | Wk^T | Wv^T]

    q = jnp.dot(xq, w[:, 0:E], preferred_element_type=jnp.float32)          # (TQ, E)
    k = jnp.dot(xkv, w[:, E:2 * E], preferred_element_type=jnp.float32)     # (T,  E)
    v = jnp.dot(xkv, w[:, 2 * E:3 * E], preferred_element_type=jnp.float32)  # (T,  E)

    # q @ k^T without materializing a transpose (contract last dims on the MXU).
    s = lax.dot_general(q.astype(cd), k.astype(cd),
                        dimension_numbers=(((1,), (1,)), ((), ())),
                        preferred_element_type=jnp.float32)                  # (TQ, T)

    # Tile-local causal mask (no full T x T mask buffer). No 1/sqrt(d): matches reference.
    T = xkv.shape[0]
    q0 = pl.program_id(1) * tq
    row = q0 + lax.broadcasted_iota(jnp.int32, (tq, T), 0)
    col = lax.broadcasted_iota(jnp.int32, (tq, T), 1)
    s = jnp.where(col > row, jnp.float32(-1e30), s)      # NaN-safe stand-in for -inf

    m = jnp.max(s, axis=-1, keepdims=True)
    p = jnp.exp(s - m)
    denom = jnp.sum(p, axis=-1, keepdims=True)
    p = p * pl.reciprocal(denom, approx=False)            # (TQ, T), f32 softmax

    o_h = jnp.dot(p.astype(cd), v.astype(cd),
                  preferred_element_type=jnp.float32)      # (TQ, E)

    # Fused fc_out: fc(concat_h o_h) = sum_h o_h @ W_fc^T[h*E:(h+1)*E, :]  (+ bias once)
    acc_ref[...] += jnp.dot(o_h.astype(cd), wfc_ref[...].astype(cd),
                            preferred_element_type=jnp.float32)

    @pl.when(h == pl.num_programs(2) - 1)
    def _finalize():
        o_ref[...] = (acc_ref[...] + bfc_ref[...]).astype(o_ref.dtype)


def mha_with_fc(x, w_qkv, w_fc_heads, b_fc_row, *, tq=None,
                compute_dtype=jnp.float32):
    """x: [B, T, E]; w_qkv: [H, E, 3E]; w_fc_heads: [H, E, E]; b_fc_row: [1, E]
    -> [B, T, E] (attention + fc_out fused)."""
    B, T, E = x.shape
    H = w_qkv.shape[0]

    if tq is None:
        tq = T if T <= 512 else 512
    if tq != T and tq % 8 != 0:                 # keep (8,128) block constraint happy
        tq = max(8, (tq // 8) * 8)
    nq = pl.cdiv(T, tq)

    kernel = functools.partial(_mha_fc_kernel, embed_size=E, tq=tq,
                               compute_dtype=compute_dtype)

    return pl.pallas_call(
        kernel,
        out_shape=jax.ShapeDtypeStruct((B, T, E), jnp.float32),
        grid_spec=pltpu.PrefetchScalarGridSpec(
            num_scalar_prefetch=0,
            grid=(B, nq, H),                                # heads = innermost reduction
            in_specs=[
                # x query-row tile for this grid step
                pl.BlockSpec((pl.Squeezed(), tq, E), lambda b, qi, h: (b, qi, 0)),
                # full-sequence x for K/V projections
                pl.BlockSpec((pl.Squeezed(), T, E), lambda b, qi, h: (b, 0, 0)),
                # this head's contiguous [Wq^T | Wk^T | Wv^T]
                pl.BlockSpec((pl.Squeezed(), E, 3 * E), lambda b, qi, h: (h, 0, 0)),
                # this head's block of W_fc^T
                pl.BlockSpec((pl.Squeezed(), E, E), lambda b, qi, h: (h, 0, 0)),
                # resident fc bias
                pl.BlockSpec((1, E), lambda b, qi, h: (0, 0)),
            ],
            out_specs=pl.BlockSpec((pl.Squeezed(), tq, E),
                                   lambda b, qi, h: (b, qi, 0)),
            scratch_shapes=[pltpu.VMEM((tq, E), jnp.float32)],
        ),
        compiler_params=pltpu.CompilerParams(
            dimension_semantics=("parallel", "parallel", "arbitrary"),
            vmem_limit_bytes=32 * 1024 * 1024),
    )(x, x, w_qkv, w_fc_heads, b_fc_row)


# ---------------------------------------------------------------------------
# Module wrapper (host-side one-time weight prep; all transposes outside kernels)
# ---------------------------------------------------------------------------
@functools.partial(jax.jit, static_argnames=("compute_dtype",))
def self_attention_forward(x, wq, wk, wv, w_fc, b_fc, compute_dtype=jnp.float32):
    B, T, E = x.shape
    H = wq.shape[0]

    # Per-head PyTorch Linear weight is (out, in); kernels want (in, out) per head,
    # laid out as [H, E, 3E] so each head's q/k/v columns are one contiguous slice.
    w_qkv = jnp.concatenate(
        [jnp.transpose(wq, (0, 2, 1)),
         jnp.transpose(wk, (0, 2, 1)),
         jnp.transpose(wv, (0, 2, 1))], axis=2)           # [H, E, 3E]

    # fc_out weight (E, H*E) -> W^T (H*E, E) -> per-head blocks [H, E, E]
    w_fc_heads = jnp.transpose(w_fc).reshape(H, E, E)
    b_fc_row = b_fc.reshape(1, E)

    return mha_with_fc(x, w_qkv, w_fc_heads, b_fc_row,
                       compute_dtype=compute_dtype)        # [B, T, E]


def reference_forward(x, wq, wk, wv, w_fc, b_fc):
    """Pure-JAX reference mirroring the PyTorch module."""
    B, T, E = x.shape
    H = wq.shape[0]
    q = jnp.einsum("bte,hfe->hbtf", x, wq)
    k = jnp.einsum("bte,hfe->hbtf", x, wk)
    v = jnp.einsum("bte,hfe->hbtf", x, wv)
    s = jnp.einsum("hbif,hbjf->hbij", q, k)
    mask = jnp.triu(jnp.ones((T, T), dtype=bool), k=1)
    s = jnp.where(mask[None, None], -jnp.inf, s)
    p = jax.nn.softmax(s, axis=-1)
    o = jnp.einsum("hbij,hbjf->bihf", p, v).reshape(B, T, H * E)
    return o @ w_fc.T + b_fc


if __name__ == "__main__":
    # H*E = 128 (lane-dense fused head dimension), E = 32, T = 8, B = 2.
    B, T, E, H = 2, 8, 32, 4

    key = jax.random.PRNGKey(0)
    kx, kq, kk, kv, kw, kb = jax.random.split(key, 6)

    x = jax.random.normal(kx, (B, T, E), dtype=jnp.float32)
    # PyTorch nn.Linear(E, E, bias=False): weight shape (E, E). Stack per head.
    wq = jax.random.normal(kq, (H, E, E), dtype=jnp.float32) * 0.1
    wk = jax.random.normal(kk, (H, E, E), dtype=jnp.float32) * 0.1
    wv = jax.random.normal(kv, (H, E, E), dtype=jnp.float32) * 0.1
    # fc_out: nn.Linear(H*E, E): weight (E, H*E), bias (E,)
    w_fc = jax.random.normal(kw, (E, H * E), dtype=jnp.float32) * 0.1
    b_fc = jax.random.normal(kb, (E,), dtype=jnp.float32) * 0.1

    ref = reference_forward(x, wq, wk, wv, w_fc, b_fc)

    # f32 operands: bit-close to the PyTorch/JAX reference.
    out = jax.block_until_ready(self_attention_forward(x, wq, wk, wv, w_fc, b_fc))
    assert out.shape == (B, T, E)
    assert jnp.allclose(out, ref, atol=1e-4, rtol=1e-4), "f32 mismatch vs reference"

    # bf16 MXU operands, f32 accumulation: accepted accuracy tradeoff (looser tol).
    out_bf16 = jax.block_until_ready(
        self_attention_forward(x, wq, wk, wv, w_fc, b_fc,
                               compute_dtype=jnp.bfloat16))
    assert out_bf16.shape == (B, T, E)
    assert bool(jnp.all(jnp.isfinite(out_bf16)))
    assert jnp.allclose(out_bf16, ref, atol=1e-1, rtol=1e-1), "bf16 path diverged"

    print("KERNEL_OK")
</pallas_src>

<mosaic_0001>
module attributes {stable_mosaic.version = 11 : i64} {
  func.func @_mha_fc_kernel(%arg0: i32, %arg1: i32, %arg2: i32, %arg3: memref<1x8x32xf32, #tpu.memory_space<vmem>>, %arg4: memref<1x8x32xf32, #tpu.memory_space<vmem>>, %arg5: memref<1x32x96xf32, #tpu.memory_space<vmem>>, %arg6: memref<1x32x32xf32, #tpu.memory_space<vmem>>, %arg7: memref<1x32xf32, #tpu.memory_space<vmem>>, %arg8: memref<1x8x32xf32, #tpu.memory_space<vmem>>, %arg9: memref<8x32xf32, #tpu.memory_space<vmem>>) attributes {dimension_semantics = [#tpu.dimension_semantics<parallel>, #tpu.dimension_semantics<parallel>, #tpu.dimension_semantics<arbitrary>], iteration_bounds = array<i64: 2, 1, 4>, scalar_prefetch = 0 : i64, scratch_operands = 1 : i64, tpu.core_type = #tpu.core_type<tc>, window_params = [{transform_indices = @transform_0, window_bounds = array<i64: 1, 8, 32>}, {transform_indices = @transform_1, window_bounds = array<i64: 1, 8, 32>}, {transform_indices = @transform_2, window_bounds = array<i64: 1, 32, 96>}, {transform_indices = @transform_3, window_bounds = array<i64: 1, 32, 32>}, {pipeline_mode = #tpu.pipeline_mode<synchronous>, transform_indices = @transform_4, window_bounds = array<i64: 1, 32>}, {transform_indices = @transform_5, window_bounds = array<i64: 1, 8, 32>}]} {
    %c0_i32 = arith.constant 0 : i32
    %0 = arith.cmpi eq, %arg2, %c0_i32 : i32
    %1 = arith.extui %0 : i1 to i32
    %c0_i32_0 = arith.constant 0 : i32
    %2 = arith.cmpi ne, %1, %c0_i32_0 : i32
    scf.if %2 {
      %cst_25 = arith.constant 0.000000e+00 : f32
      %44 = vector.broadcast %cst_25 : f32 to vector<8x32xf32>
      %c0_26 = arith.constant 0 : index
      %c0_27 = arith.constant 0 : index
      %45 = vector.load %arg9[%c0_26, %c0_27] : memref<8x32xf32, #tpu.memory_space<vmem>>, vector<8x32xf32>
      tpu.vector_store %arg9[%c0_26, %c0_27], %44 {strides = array<i32>} : memref<8x32xf32, #tpu.memory_space<vmem>>, vector<8x32xf32>,
    } else {
    }
    %c0 = arith.constant 0 : index
    %c0_1 = arith.constant 0 : index
    %c0_2 = arith.constant 0 : index
    %3 = vector.load %arg3[%c0, %c0_1, %c0_2] : memref<1x8x32xf32, #tpu.memory_space<vmem>>, vector<1x8x32xf32>
    %4 = vector.shape_cast %3 : vector<1x8x32xf32> to vector<8x32xf32>
    %c0_3 = arith.constant 0 : index
    %c0_4 = arith.constant 0 : index
    %c0_5 = arith.constant 0 : index
    %5 = vector.load %arg4[%c0_3, %c0_4, %c0_5] : memref<1x8x32xf32, #tpu.memory_space<vmem>>, vector<1x8x32xf32>
    %6 = vector.shape_cast %5 : vector<1x8x32xf32> to vector<8x32xf32>
    %c0_6 = arith.constant 0 : index
    %c0_7 = arith.constant 0 : index
    %c0_8 = arith.constant 0 : index
    %7 = vector.load %arg5[%c0_6, %c0_7, %c0_8] : memref<1x32x96xf32, #tpu.memory_space<vmem>>, vector<1x32x96xf32>
    %8 = vector.shape_cast %7 : vector<1x32x96xf32> to vector<32x96xf32>
    %9 = vector.extract_strided_slice %8 {offsets = [0, 0], sizes = [32, 32], strides = [1, 1]} : vector<32x96xf32> to vector<32x32xf32>
    %cst = arith.constant dense<0.000000e+00> : vector<8x32xf32>
    %10 = tpu.matmul %4, %9, %cst {dimension_numbers = #tpu.dot_dimension_numbers<[1], [0], [0], [1], [0, 0, 1, 1], [], []>} : vector<8x32xf32>, vector<32x32xf32>, vector<8x32xf32> -> vector<8x32xf32>
    %11 = vector.extract_strided_slice %8 {offsets = [0, 32], sizes = [32, 32], strides = [1, 1]} : vector<32x96xf32> to vector<32x32xf32>
    %cst_9 = arith.constant dense<0.000000e+00> : vector<8x32xf32>
    %12 = tpu.matmul %6, %11, %cst_9 {dimension_numbers = #tpu.dot_dimension_numbers<[1], [0], [0], [1], [0, 0, 1, 1], [], []>} : vector<8x32xf32>, vector<32x32xf32>, vector<8x32xf32> -> vector<8x32xf32>
    %13 = vector.extract_strided_slice %8 {offsets = [0, 64], sizes = [32, 32], strides = [1, 1]} : vector<32x96xf32> to vector<32x32xf32>
    %cst_10 = arith.constant dense<0.000000e+00> : vector<8x32xf32>
    %14 = tpu.matmul %6, %13, %cst_10 {dimension_numbers = #tpu.dot_dimension_numbers<[1], [0], [0], [1], [0, 0, 1, 1], [], []>} : vector<8x32xf32>, vector<32x32xf32>, vector<8x32xf32> -> vector<8x32xf32>
    %cst_11 = arith.constant dense<0.000000e+00> : vector<8x8xf32>
    %15 = tpu.matmul %10, %12, %cst_11 {dimension_numbers = #tpu.dot_dimension_numbers<[1], [1], [0], [0], [0, 0, 1, 0], [], []>} : vector<8x32xf32>, vector<8x32xf32>, vector<8x8xf32> -> vector<8x8xf32>
    %c8_i32 = arith.constant 8 : i32
    %16 = arith.muli %arg1, %c8_i32 : i32
    %17 = tpu.iota {dimensions = array<i32: 0>} : vector<8x8xi32>
    %18 = vector.broadcast %16 : i32 to vector<8x8xi32>
    %19 = arith.addi %18, %17 : vector<8x8xi32>
    %20 = tpu.iota {dimensions = array<i32: 1>} : vector<8x8xi32>
    %21 = arith.cmpi sgt, %20, %19 : vector<8x8xi32>
    %cst_12 = arith.constant -1.000000e+30 : f32
    %22 = vector.broadcast %cst_12 : f32 to vector<8x8xf32>
    %23 = arith.select %21, %22, %15 : vector<8x8xi1>, vector<8x8xf32>
    %cst_13 = arith.constant dense<0xFF800000> : vector<8xf32>
    %24 = vector.multi_reduction <maximumf>, %23, %cst_13 [1] : vector<8x8xf32> to vector<8xf32>
    %25 = vector.shape_cast %24 : vector<8xf32> to vector<8x1xf32>
    %26 = vector.broadcast %25 : vector<8x1xf32> to vector<8x8xf32>
    %27 = arith.subf %23, %26 : vector<8x8xf32>
    %28 = math.exp %27 : vector<8x8xf32>
    %cst_14 = arith.constant dense<0.000000e+00> : vector<8xf32>
    %29 = vector.multi_reduction <add>, %28, %cst_14 [1] : vector<8x8xf32> to vector<8xf32>
    %30 = vector.shape_cast %29 : vector<8xf32> to vector<8x1xf32>
    %31 = tpu.reciprocal %30 : vector<8x1xf32> -> vector<8x1xf32>
    %32 = vector.broadcast %31 : vector<8x1xf32> to vector<8x8xf32>
    %33 = arith.mulf %28, %32 : vector<8x8xf32>
    %cst_15 = arith.constant dense<0.000000e+00> : vector<8x32xf32>
    %34 = tpu.matmul %33, %14, %cst_15 {dimension_numbers = #tpu.dot_dimension_numbers<[1], [0], [0], [1], [0, 0, 1, 1], [], []>} : vector<8x8xf32>, vector<8x32xf32>, vector<8x32xf32> -> vector<8x32xf32>
    %c0_16 = arith.constant 0 : index
    %c0_17 = arith.constant 0 : index
    %35 = vector.load %arg9[%c0_16, %c0_17] : memref<8x32xf32, #tpu.memory_space<vmem>>, vector<8x32xf32>
    %c0_18 = arith.constant 0 : index
    %c0_19 = arith.constant 0 : index
    %c0_20 = arith.constant 0 : index
    %36 = vector.load %arg6[%c0_18, %c0_19, %c0_20] : memref<1x32x32xf32, #tpu.memory_space<vmem>>, vector<1x32x32xf32>
    %37 = vector.shape_cast %36 : vector<1x32x32xf32> to vector<32x32xf32>
    %cst_21 = arith.constant dense<0.000000e+00> : vector<8x32xf32>
    %38 = tpu.matmul %34, %37, %cst_21 {dimension_numbers = #tpu.dot_dimension_numbers<[1], [0], [0], [1], [0, 0, 1, 1], [], []>} : vector<8x32xf32>, vector<32x32xf32>, vector<8x32xf32> -> vector<8x32xf32>
    %39 = arith.addf %35, %38 : vector<8x32xf32>
    %c0_22 = arith.constant 0 : index
    %c0_23 = arith.constant 0 : index
    %40 = vector.load %arg9[%c0_22, %c0_23] : memref<8x32xf32, #tpu.memory_space<vmem>>, vector<8x32xf32>
    tpu.vector_store %arg9[%c0_22, %c0_23], %39 {strides = array<i32>} : memref<8x32xf32, #tpu.memory_space<vmem>>, vector<8x32xf32>,
    %c3_i32 = arith.constant 3 : i32
    %41 = arith.cmpi eq, %arg2, %c3_i32 : i32
    %42 = arith.extui %41 : i1 to i32
    %c0_i32_24 = arith.constant 0 : i32
    %43 = arith.cmpi ne, %42, %c0_i32_24 : i32
    scf.if %43 {
      %c0_25 = arith.constant 0 : index
      %c0_26 = arith.constant 0 : index
      %44 = vector.load %arg9[%c0_25, %c0_26] : memref<8x32xf32, #tpu.memory_space<vmem>>, vector<8x32xf32>
      %c0_27 = arith.constant 0 : index
      %c0_28 = arith.constant 0 : index
      %45 = vector.load %arg7[%c0_27, %c0_28] : memref<1x32xf32, #tpu.memory_space<vmem>>, vector<1x32xf32>
      %46 = vector.broadcast %45 : vector<1x32xf32> to vector<8x32xf32>
      %47 = arith.addf %44, %46 : vector<8x32xf32>
      %c0_29 = arith.constant 0 : index
      %c0_30 = arith.constant 0 : index
      %c0_31 = arith.constant 0 : index
      %48 = vector.load %arg8[%c0_29, %c0_30, %c0_31] : memref<1x8x32xf32, #tpu.memory_space<vmem>>, vector<1x8x32xf32>
      %49 = vector.shape_cast %48 : vector<1x8x32xf32> to vector<8x32xf32>
      %50 = vector.shape_cast %47 : vector<8x32xf32> to vector<1x8x32xf32>
      tpu.vector_store %arg8[%c0_29, %c0_30, %c0_31], %50 {strides = array<i32>} : memref<1x8x32xf32, #tpu.memory_space<vmem>>, vector<1x8x32xf32>,
    } else {
    }
    return
  }
  func.func @transform_0(%arg0: i32, %arg1: i32, %arg2: i32) -> (i32, i32, i32) {
    %c0_i32 = arith.constant 0 : i32
    %c0_i32_0 = arith.constant 0 : i32
    return %arg0, %arg1, %c0_i32 : i32, i32, i32
  }
  func.func @transform_1(%arg0: i32, %arg1: i32, %arg2: i32) -> (i32, i32, i32) {
    %c0_i32 = arith.constant 0 : i32
    %c0_i32_0 = arith.constant 0 : i32
    %c0_i32_1 = arith.constant 0 : i32
    return %arg0, %c0_i32, %c0_i32_0 : i32, i32, i32
  }
  func.func @transform_2(%arg0: i32, %arg1: i32, %arg2: i32) -> (i32, i32, i32) {
    %c0_i32 = arith.constant 0 : i32
    %c0_i32_0 = arith.constant 0 : i32
    %c0_i32_1 = arith.constant 0 : i32
    return %arg2, %c0_i32, %c0_i32_0 : i32, i32, i32
  }
  func.func @transform_3(%arg0: i32, %arg1: i32, %arg2: i32) -> (i32, i32, i32) {
    %c0_i32 = arith.constant 0 : i32
    %c0_i32_0 = arith.constant 0 : i32
    %c0_i32_1 = arith.constant 0 : i32
    return %arg2, %c0_i32, %c0_i32_0 : i32, i32, i32
  }
  func.func @transform_4(%arg0: i32, %arg1: i32, %arg2: i32) -> (i32, i32) {
    %c0_i32 = arith.constant 0 : i32
    %c0_i32_0 = arith.constant 0 : i32
    %c0_i32_1 = arith.constant 0 : i32
    return %c0_i32, %c0_i32_0 : i32, i32
  }
  func.func @transform_5(%arg0: i32, %arg1: i32, %arg2: i32) -> (i32, i32, i32) {
    %c0_i32 = arith.constant 0 : i32
    %c0_i32_0 = arith.constant 0 : i32
    return %arg0, %arg1, %c0_i32 : i32, i32, i32
  }
}

</mosaic_0001>

<bundles_post_ra>
// kernel: self_attention_forward.1
= control target key start
LH: loop header
LB: loop body
LE: loop exit
PB: predicated region body
PF: predicated region fallthrough
CT: control target
= control target key end

     0   :  { %10 = vsyncpa [#allocation4], 0  ;;  %s1512_s0 = inlined_call_operand.vmem [shape: f32[2,8,32], index: 0, kind: input, shape index: {}, may-alias: {0,1}]   ;;  %s1513_s1 = inlined_call_operand.vmem [shape: f32[2,8,32], index: 1, kind: input, shape index: {}, may-alias: {0,1}]   ;;  %s1514_s2 = inlined_call_operand.vmem [shape: f32[4,32,96], index: 2, kind: input, shape index: {}]   ;;  %s1515_s3 = inlined_call_operand.vmem [shape: f32[4,32,32], index: 3, kind: input, shape index: {}]   ;;  %s1516_s4 = inlined_call_operand.vmem [shape: f32[1,32], index: 4, kind: input, shape index: {}]   ;;  %s1517_s5 = inlined_call_operand.hbm [shape: f32[2,8,32], index: 5, kind: output, shape index: {}]  }
   0x1   :  { %12 = vsyncpa [#allocation4 + $0x1], 0  ;;  %s1322_s18 = smov 0   ;;  %s1324_s19 = smov 0  }
   0x2   :  { %s1326_s20 = smov 0   ;;  %s1328_s21 = smov 0  }
   0x3   :  { %s1330_s22 = smov 0   ;;  %s1332_s23 = smov 0  }
   0x4   :  { %s1334_s24 = smov 0   ;;  %s1336_s25 = smov 0  }
   0x5 LB: > { %1522 = sst [smem:[#allocation6_spill]] %s1275_s23  ;;  %s958_s26 = sadd.s32 4294967295, %s1283_s25   ;;  %s1283_s25 = sphi %s1336_s25, %s18_s25   ;;  %s1279_s24 = sphi %s1334_s24, %s1534_s24   ;;  %s1275_s23 = sphi %s1332_s23, %s1533_s23   ;;  %s1271_s22 = sphi %s1330_s22, %s1532_s22   ;;  %s1267_s21 = sphi %s1328_s21, %s1531_s21   ;;  %s1263_s20 = sphi %s1326_s20, %s1537_s20   ;;  %s1259_s19 = sphi %s1324_s19, %s1536_s19   ;;  %s1255_s18 = sphi %s1322_s18, %s1535_s18  }
   0x6   : > { %1523 = sst [smem:[#allocation7_spill]] %s1279_s24  ;;  %s959_s27 = sadd.s32 4294967294, %s1283_s25  }
   0x7   : > { %s30_s28 = sadd.s32 1, %s1275_s23  ;;  %s37_s29 = sadd.s32 1, %s1279_s24 }
   0x8   : > { %p31_p0 = scmp.ge.s32.totalorder %s30_s28, 4  ;;  %p183_p1 = scmp.ne.s32.totalorder %s1263_s20, %s1259_s19 }
   0x9   : > { %p184_p2 = scmp.eq.s32.totalorder %s958_s26, 7  ;;  %p189_p4 = scmp.ne.s32.totalorder %s1259_s19, %s1255_s18 }
   0xa   : > { %s1539_s28 = smov (%p31_p0, %s30_s28), 0  ;;  %s1541_s29 = smov (!%p31_p0, %s37_s29), %s1279_s24 }
   0xb   : > { %1524 = sst [smem:[#allocation8_spill]] %s1539_s28  ;;  %p1371_p3 = por %p184_p2, %p183_p1 }
   0xc   : > { %p39_p5 = scmp.ge.s32.totalorder %s1541_s29, 2  ;;  %p190_p6 = scmp.eq.s32.totalorder %s959_s27, 7 }
   0xd   : > { %p962_p7 = scmp.ge.s32.totalorder %s1283_s25, 1  ;;  %p244_p8 = scmp.lt.s32.totalorder %s1283_s25, 9 }
   0xe   : > { %s1543_s29 = smov (%p39_p5, %s1541_s29), 0  ;;  %p1381_p9 = por %p190_p6, %p189_p4 }
   0xf   : > { %1526 = sst [smem:[#allocation9_spill]] %s1543_s29  ;;  %p245_p10 = pnand %p962_p7, %p244_p8 }
  0x10   : > { %s168_s7 = ssub.s32 %s1279_s24, %s1543_s29  ;;  %s173_s8 = sadd.s32 1, %s1263_s20 }
  0x11   : > { %p171_p11 = scmp.eq.s32.totalorder %s168_s7, 0  ;;  %248 = sbr.rel (%p245_p10) target bundleno = 1368 (0x558), region = 40 }
  0x12   : > { %s1519_s10 = sand.u32 (!%p245_p10), 1, %s1259_s19   ;;  %p288_p12 = scmp.lt.s32.totalorder (!%p245_p10), %s1271_s22, 1 }
  0x13   : > { %s1389_s9 = scalar_select %p171_p11, %s1263_s20, %s173_s8  }
  0x14   : > { %s1395_s11 = sshll.u32 (!%p245_p10), %s1519_s10, 3  ;;  %p299_p13 = scmp.lt.s32.totalorder (!%p245_p10), %s1267_s21, 3 }
  0x15   : > { %1528 = sst [smem:[#allocation10_spill]] %s1389_s9  ;;  %p970_p0 = scmp.ne.s32.totalorder (!%p245_p10), %s1267_s21, 0 }
  0x18   : > { %s289_s12 = scalar_select %p288_p12, %s1271_s22, 1 }
  0x19   : > { %s300_s13 = scalar_select %p299_p13, %s1267_s21, 3 }
  0x1a   : > { %s964_s14 = sshll.u32 %s289_s12, 3  ;;  %s287_s12 = scalar_lea.vmem [#allocation3], %s1395_s11  ;;  %vm313_vm0 = vcmask (!%p970_p0), 261120   ;;  %v1285_v0 = vmov (!%p970_p0), 0.0  }
  0x1b   : > { %s1403_s17 = scalar_lea.vmem %s1512_s0, %s964_s14  ;;  %s1408_s7 = scalar_lea.vmem %s1513_s1, %s964_s14  ;;  %314 = vst.msk [vmem:[#allocation2] sm:$0xff] (!%p970_p0), %vm313_vm0, %v1285_v0 }
  0x1c   : > { %s984_s8 = sshll.u32 %s300_s13, 5  ;;  %312 = sbr.rel (%p970_p0) target bundleno = 35 (0x23), region = 44 }
  0x1d   : > { %s303_s10 = scalar_lea.vmem %s1514_s2, %s984_s8  ;;  %s1416_s9 = scalar_lea.vmem %s1515_s3, %s984_s8 }
  0x23 PF: > { %v317_v1 = vld [vmem:[%s303_s10] sm:$0xff]  ;;  %v318_v2 = vld [vmem:[%s303_s10 + $0x8] sm:$0xff]  ;;  %v319_v3 = vld [vmem:[%s303_s10 + $0x10] sm:$0xff]  ;;  %v1286_v6 = vmov 0.0|0.0   ;;  %vm1287_vm1 = vmmov 0   ;;  %v1288_v8 = vmov 0.0   ;;  %v643_v33 = vlaneseq }
  0x24   : > { %v1165_v4 = vpack.i.bf16 %v318_v2, %v317_v1  ;;  %v320_v5 = vld [vmem:[%s303_s10 + $0x18] sm:$0xff]  ;;  %1070 = vmatprep.subr.bf16.mxu1 %v1286_v6  ;;  %1064 = vmatprep.subr.bf16.mxu0 %v1286_v6  ;;  %v1065_v7 = vpack.c.bf16 %v318_v2, %v317_v1  ;;  %s1289_s23 = smov 96   ;;  %v315_v11 = vld [vmem:[%s1403_s17] sm:$0xff]  ;;  %vm321_vm2 = vcmask 261120   ;;  %s1290_s24 = smov 64   ;;  %vm651_vm4 = vcmask 64512  }
  0x25   : > { %1029 = vmatprep.mubr.msk.f32.mxu1 %vm1287_vm1, %v1288_v8  ;;  %1018 = vmatprep.mubr.msk.f32.mxu0 %vm1287_vm1, %v1288_v8  ;;  %v1170_v9 = vpack.i.bf16 %v320_v5, %v319_v3  ;;  %v1068_v10 = vpack.c.bf16 %v320_v5, %v319_v3  ;;  %v316_v20 = vld [vmem:[%s1408_s7] sm:$0xff]  ;;  %v644_v34 = vshrl.u32 %v643_v33, 7  ;;  %v648_v35 = vand.u32 127, %v643_v33  ;;  %v738_v48 = vld [vmem:[%s1416_s9 + $0x8] sm:$0xff]  ;;  %v739_v49 = vld [vmem:[%s1416_s9 + $0x10] sm:$0xff]  ;;  %p978_p1 = scmp.ne.s32.totalorder %s1267_s21, 3 }
  0x26   : > { %1166 = vrot.lane.b32.xlu0 %v1165_v4, %s1289_s23  ;;  %1066 = vmatpush3.bf16.msra.mxu0 %v1065_v7  ;;  %v737_v47 = vld [vmem:[%s1416_s9] sm:$0xff]  ;;  %v740_v51 = vld [vmem:[%s1416_s9 + $0x18] sm:$0xff] }
  0x27   : > { %1067 = vmatprep.subr.bf16.mxu0 %v1286_v6  ;;  %1176 = vrot.lane.b32.xlu1 %v1165_v4, %s1290_s24  ;;  %vm649_vm3 = vcmp.gt.s32.totalorder %v648_v35, %v644_v34  ;;  %v1083_v50 = vpack.c.bf16 %v738_v48, %v737_v47  ;;  %v1086_v52 = vpack.c.bf16 %v740_v51, %v739_v49  ;;  %v736_v58 = vld [vmem:[#allocation2] sm:$0xff] }
  0x28   : > { %v979_v63 = vld [vmem:[%s1516_s4] ss:$0 sm:$0xff] (!%p978_p1) }
  0x2a   : > { %1171 = vrot.lane.b32.xlu0 %v1170_v9, %s1289_s23  ;;  %1069 = vmatpush3.bf16.msra.mxu0 %v1068_v10 }
  0x2b   : > { %1076 = vmatprep.subr.bf16.mxu0 %v1286_v6  ;;  %1181 = vrot.lane.b32.xlu1 %v1170_v9, %s1290_s24 }
  0x2d   : > { %1019 = vmatmul.mubr.msk.f32.vlgmr.msra.gmra.mrb[0].mxu0 %vm321_vm2, %v315_v11 }
  0x2e   : > { %1040 = vmatprep.mubr.msk.f32.mxu0 %vm1287_vm1, %v1288_v8 }
  0x98   : > { %v1167_v12 = vpop.permute.xlu0 %1166 }
  0x99   : > { %v1169_v13 = vunpack.i.h.bf16 %v1167_v12  ;;  %v1168_v14 = vunpack.i.l.bf16 %v1167_v12  ;;  %v1177_v25 = vpop.permute.xlu1 %1176 }
  0x9a   : > { %v1179_v26 = vunpack.i.h.bf16 %v1177_v25  ;;  %v1178_v27 = vunpack.i.l.bf16 %v1177_v25 }
  0x9b   : > { %v1071_v15 = vpack.c.bf16 %v1169_v13, %v1168_v14 }
  0x9c   : > { %v1172_v16 = vpop.permute.xlu0 %1171  ;;  %v1077_v28 = vpack.c.bf16 %v1179_v26, %v1178_v27 }
  0x9d   : > { %v1174_v17 = vunpack.i.h.bf16 %v1172_v16  ;;  %v1173_v18 = vunpack.i.l.bf16 %v1172_v16  ;;  %1072 = vmatpush3.bf16.msra.mxu1 %v1071_v15  ;;  %v1182_v29 = vpop.permute.xlu1 %1181 }
  0x9e   : > { %1073 = vmatprep.subr.bf16.mxu1 %v1286_v6  ;;  %v1184_v30 = vunpack.i.h.bf16 %v1182_v29  ;;  %v1183_v31 = vunpack.i.l.bf16 %v1182_v29  ;;  %1078 = vmatpush3.bf16.msra.mxu0 %v1077_v28 }
  0x9f   : > { %v1074_v19 = vpack.c.bf16 %v1174_v17, %v1173_v18  ;;  %1079 = vmatprep.subr.bf16.mxu0 %v1286_v6 }
  0xa0   : > { %v1080_v32 = vpack.c.bf16 %v1184_v30, %v1183_v31 }
  0xa1   : > { %1075 = vmatpush3.bf16.msra.mxu1 %v1074_v19 }
  0xa2   : > { %1043 = vmatprep.subr.mxu1 %v1288_v8  ;;  %1081 = vmatpush3.bf16.msra.mxu0 %v1080_v32 }
  0xa3   : > { %1082 = vmatprep.subr.bf16.mxu0 %v1286_v6 }
  0xa4   : > { %1030 = vmatmul.mubr.msk.f32.vlgmr.msra.gmra.mrb[0].mxu1 %vm321_vm2, %v316_v20 }
  0xa5   : > { %1045 = vmatprep.mubr.msk.f32.mxu1 %vm1287_vm1, %v1288_v8  ;;  %1041 = vmatmul.mubr.msk.f32.vlgmr.msra.gmra.mrb[2].mxu0 %vm321_vm2, %v316_v20 }
  0xa6   : > { %1061 = vmatprep.mubr.msk.f32.mxu0 %vm1287_vm1, %v1288_v8  ;;  %1084 = vmatpush3.bf16.msra.mxu0 %v1083_v50 }
  0xa7   : > { %1085 = vmatprep.subr.bf16.mxu0 %v1286_v6 }
  0xaa   : > { %1087 = vmatpush3.bf16.msra.mxu0 %v1086_v52 }
 0x100   : > { %v391_v21 = vpop.f32.mrb[0].mxu0 }
 0x101   : > { %v1020_v22 = vpop.f32.mrb[1].mxu0 }
 0x177   : > { %v480_v23 = vpop.f32.mrb[0].mxu1 }
 0x178   : > { %v1031_v24 = vpop.f32.mrb[1].mxu1  ;;  %1044 = vmatpush3.xpose.msk.msra.mxu1 %vm321_vm2, %v480_v23  ;;  %v562_v45 = vpop.f32.mrb[2].mxu0 }
 0x179   : > { %1048 = vmatprep.subr.mxu1 %v1288_v8  ;;  %v1042_v46 = vpop.f32.mrb[3].mxu0 }
 0x17b   : > { %1046 = vmatmul.mubr.msk.f32.vlgmr.msra.gmra.mrb[2].mxu1 %vm321_vm2, %v391_v21 }
 0x17c   : > { %1050 = vmatprep.mubr.msk.f32.mxu1 %vm1287_vm1, %v1288_v8  ;;  %1049 = vmatpush3.msra.mxu1 %v562_v45 }
 0x24e   : > { %v638_v36 = vpop.f32.mrb[2].mxu1 }
 0x24f   : > { %v650_v37 = vsel %vm649_vm3, -1e+30, %v638_v36  ;;  %v1047_v38 = vpop.f32.mrb[3].mxu1 }
 0x250   : > { %v652_v39 = vsel %vm651_vm4, %v650_v37, -inf }
 0x251   : > { %653 = vmax.xlane.f32.xlu0 %v652_v39 }
 0x2de   : > { %v654_v40 = vpop.xlane.xlu0 %653 }
 0x2df   : > { %v655_v41 = vsub.f32 %v650_v37, %v654_v40 }
 0x2e1   : > { %v656_v42 = vmul.f32 1.442695, %v655_v41 }
 0x2e3   : > { %1185 = vpow2.f32 %v656_v42 }
 0x2ed   : > { %v1186_v43 = vpop.eup %1185 }
 0x2ee   : > { %v658_v44 = vsel %vm651_vm4, %v1186_v43, 0.0 }
 0x2ef   : > { %659 = vadd.xlane.f32.xlu1 %v658_v44 }
 0x37c   : > { %v660_v53 = vpop.xlane.xlu1 %659 }
 0x37d   : > { %1187 = vrcp.f32 %v660_v53 }
 0x387   : > { %v1188_v54 = vpop.eup %1187 }
 0x388   : > { %v662_v55 = vmul.f32 %v1188_v54, %v1186_v43 }
 0x38a   : > { %1051 = vmatmul.mubr.msk.f32.vlgmr.msra.gmra.mrb[4].mxu1 %vm651_vm4, %v662_v55 }
 0x45d   : > { %v732_v56 = vpop.f32.mrb[4].mxu1 }
 0x45e   : > { %v1052_v57 = vpop.f32.mrb[5].mxu1  ;;  %1062 = vmatmul.mubr.msk.f32.vlgmr.msra.gmra.mrb[4].mxu0 %vm321_vm2, %v732_v56 }
 0x52e   : > { %819 = sbr.rel (%p978_p1) target bundleno = 1343 (0x53f), region = 48 }
 0x531   : > { %v810_v59 = vpop.f32.mrb[4].mxu0 }
 0x532   : > { %v814_v60 = vadd.f32 %v810_v59, %v736_v58  ;;  %v1063_v61 = vpop.f32.mrb[5].mxu0 }
 0x534   : > { %815 = vst.msk [vmem:[#allocation2] sm:$0xff] %vm321_vm2, %v814_v60 }
 0x53b   : > { %v820_v62 = vld [vmem:[#allocation2] sm:$0xff] }
 0x53c   : > { %v828_v0 = vadd.f32 %v979_v63, %v820_v62 }
 0x53e   : > { %829 = vst.msk [vmem:[%s287_s12] sm:$0xff] %vm321_vm2, %v828_v0 }
 0x53f PF: > { %s981_s9 = sshll.u32 %s1271_s22, 7  ;;  %s845_s14 = sshll.u32 %s287_s12, 4  ;;  %s846_s14 = int_to_ptr.vmem [resolvable:$true] %s845_s14 }
 0x540   : > { %s1461_s21 = scalar_lea.hbm %s1517_s5, %s981_s9  ;;  %s1529_s15 = sand.u32 1, %s1259_s19  }
 0x541   : > { %s831_s16 = scalar_lea.sflag [#allocation4], %s1529_s15  ;;  %s1189_s17 = scalar_lea.vmem %s846_s14, 128 }
 0x542   : > { %p1190_p2 = scmp.ne.s32.totalorder %s846_s14, %s1189_s17  ;;  %s1291_s26 = smov [#allocation3]  }
 0x543   : > { %s1193_s27 = sshll.u32 %s1291_s26, 4  ;;  %s1194_s27 = int_to_ptr.vmem [resolvable:$false] %s1193_s27 }
 0x544   : > { %p1191_p4 = pnand %p1190_p2, %p1371_p3  ;;  %s1195_s7 = scalar_lea.vmem %s1194_s27, 256 }
 0x545   : > { %p1196_p6 = scmp.lt.s32.totalorder %s846_s14, %s1194_s27  ;;  %p1197_p7 = scmp.lt.s32.totalorder %s1195_s7, %s1189_s17 }
 0x546   : > { %p1192_p5 = pneg %p1191_p4 }
 0x547   : > { %p1198_p8 = por %p1197_p7, %p1196_p6 }
 0x549   : > { %p1199_p10 = pnand %p1198_p8, %p1192_p5 }
 0x54b   : > { %1202 = shalt.err (!%p1199_p10)
}
 0x54c   : > { %s1203_s22 = scalar_lea.hbm %s1461_s21, 128  ;;  %s1207_s12 = scalar_lea.hbm %s1517_s5, 256 }
 0x54d   : > { %p1204_p11 = scmp.ne.s32.totalorder %s1461_s21, %s1203_s22  ;;  %p1208_p0 = scmp.lt.u32.totalorder %s1461_s21, %s1517_s5 }
 0x54e   : > { %p1209_p1 = scmp.lt.u32.totalorder %s1207_s12, %s1203_s22  ;;  %p1211_p4 = scmp.lt.u32.totalorder %s1203_s22, %s1461_s21 }
 0x54f   : > { %p1205_p12 = pnand %p1204_p11, %p1371_p3 }
 0x550   : > { %p1210_p2 = por %p1209_p1, %p1208_p0 }
 0x551   : > { %p1206_p13 = pneg %p1205_p12 }
 0x552   : > { %p1212_p5 = por %p1211_p4, %p1210_p2 }
 0x554   : > { %p1213_p6 = pnand %p1212_p5, %p1206_p13 }
 0x556   : > { %1216 = shalt.err (!%p1213_p6)
}
 0x557   : > { %1088 = dma.vmem_to_hbm [thread:$0]  (%p1371_p3), %s846_s14, 128, %s1461_s21, %s831_s16  }
 0x558 PF: > { %p1094_p7 = scmp.ge.s32.totalorder %s1283_s25, 2  ;;  %s857_s28 = sand.u32 1, %s1255_s18  }
 0x559   : > { %s858_s29 = scalar_lea.sflag [#allocation4], %s857_s28 }
 0x55a   : > { %p1091_p8 = pnand %p1094_p7, %p1381_p9 }
 0x55c   : > { %1250 = dma.done.wait (!%p1091_p8), %s858_s29, 128  }
 0x55d   : > { %1252 = vsyncadd (!%p1091_p8), %s858_s29, 4294967168  ;;  %s18_s25 = sadd.s32 1, %s1283_s25   ;;  %s1530_s9 = sld [smem:[#allocation10_spill]] }
 0x55e   : > { %p15_p10 = scmp.ge.s32.totalorder %s18_s25, 10   ;;  %s1531_s21 = sld [smem:[#allocation6_spill]] }
 0x55f   : > { %s1532_s22 = sld [smem:[#allocation7_spill]]  ;;  %s1533_s23 = sld [smem:[#allocation8_spill]] }
 0x560   : > { %s1534_s24 = sld [smem:[#allocation9_spill]]  ;;  %s1535_s18 = smov %s1259_s19 }
 0x561   : > { %s1536_s19 = smov %s1263_s20  ;;  %17 = sbr.rel (!%p15_p10) target bundleno = 5 (0x5), region = 92 }
 0x563   : > { %s1537_s20 = smov %s1530_s9 }
 0x568   :  { %863 = vsyncpa [#allocation4], 1 }
 0x569   :  { %865 = vsyncpa [#allocation4 + $0x1], 1 }

</bundles_post_ra>
